<compile_context>
chip_gen: v7x
topology: tpu7x:2x2x1
jax: 0.10.0
libtpu: 0.0.40
codegen_flags: <defaults>
</compile_context>

<pallas_src>
import functools

import jax
import jax.numpy as jnp
from jax import lax
from jax.experimental import pallas as pl
from jax.experimental.pallas import tpu as pltpu

BN_EPS = 1e-5
MAX_TILE = 16384          # lanes per pixel tile (f32: x tile 192 KiB, hidden 1 MiB)


def _round_up(x, m):
    return (x + m - 1) // m * m


# ----------------------------------------------------------------------------
# Pass 1: per-channel mean / (biased) var of y1 = W1 @ x + b1 over all pixels.
# ----------------------------------------------------------------------------
def _stats_kernel(x_ref, p_ref, mean_ref, var_ref, m0_ref, s1_ref, s2_ref,
                  *, tile, p_real, count0, inv_p):
    i = pl.program_id(0)
    x = x_ref[...]                               # (3, TILE)  f32
    prm = p_ref[...]                             # (16, 4)  [W1 | b1]
    w1 = prm[:, 0:3]
    b1 = prm[:, 3:4]

    # conv1 as 3 lane-dense VPU FMAs (no MXU): y1 = W1 @ x + b1 -> (16, TILE)
    y = (w1[:, 0:1] * x[0:1, :]
         + w1[:, 1:2] * x[1:2, :]
         + w1[:, 2:3] * x[2:3, :]) + b1

    # mask out padded pixels (beyond the real N*H*W)
    idx = lax.broadcasted_iota(jnp.int32, (1, tile), 1) + i * tile
    mask = idx < p_real                          # (1, TILE)

    @pl.when(i == 0)
    def _():
        # shift = mean of tile 0 (centered accumulation avoids cancellation)
        y0 = jnp.where(mask, y, 0.0)
        m0_ref[...] = jnp.sum(y0, axis=1, keepdims=True) * (1.0 / count0)
        s1_ref[...] = jnp.zeros_like(s1_ref)
        s2_ref[...] = jnp.zeros_like(s2_ref)

    yc = jnp.where(mask, y - m0_ref[...], 0.0)   # (16, TILE) centered
    s1_ref[...] += jnp.sum(yc, axis=1, keepdims=True)
    s2_ref[...] += jnp.sum(yc * yc, axis=1, keepdims=True)

    @pl.when(i == pl.num_programs(0) - 1)
    def _():
        r = s1_ref[...] * inv_p                  # tiny residual mean
        mean_ref[...] = m0_ref[...] + r
        var_ref[...] = s2_ref[...] * inv_p - r * r


# ----------------------------------------------------------------------------
# Pass 2: fused conv1'(BN-folded) -> ReLU -> conv2 -> tanh on each pixel tile.
# ----------------------------------------------------------------------------
def _main_kernel(x_ref, p_ref, out_ref):
    x = x_ref[...]                               # (3, TILE)
    prm = p_ref[...]                             # (16, 6)  [W1' | b1' | w2 | b2]
    w1 = prm[:, 0:3]
    b1 = prm[:, 3:4]
    w2 = prm[:, 4:5]
    b2 = prm[0:1, 5:6]

    h = (w1[:, 0:1] * x[0:1, :]
         + w1[:, 1:2] * x[1:2, :]
         + w1[:, 2:3] * x[2:3, :]) + b1          # (16, TILE)
    h = jnp.maximum(h, 0.0)

    y = jnp.sum(w2 * h, axis=0, keepdims=True) + b2   # (1, TILE) sublane reduce
    out_ref[...] = jnp.tanh(y)


# ----------------------------------------------------------------------------
# Wrapper
# ----------------------------------------------------------------------------
def init_params():
    key = jax.random.PRNGKey(42)
    k1, k2, k3, k4 = jax.random.split(key, 4)
    w1 = 0.1 * jax.random.normal(k1, (16, 3), jnp.float32)    # conv1 weight (Cout, Cin)
    b1 = 0.1 * jax.random.normal(k2, (16, 1), jnp.float32)
    gamma = jnp.ones((16, 1), jnp.float32)                    # BatchNorm2d affine init
    beta = jnp.zeros((16, 1), jnp.float32)
    w2 = 0.1 * jax.random.normal(k3, (16, 1), jnp.float32)    # conv2 weight (Cin, 1)
    b2 = 0.1 * jax.random.normal(k4, (1, 1), jnp.float32)
    return (w1, b1, gamma, beta, w2, b2)


@jax.jit
def guide_nn(x_nchw, params):
    w1, b1, gamma, beta, w2, b2 = params
    N, C, H, W = x_nchw.shape
    P = N * H * W
    tile = min(MAX_TILE, _round_up(P, 128))
    num_tiles = pl.cdiv(P, tile)
    p_pad = num_tiles * tile

    # (N, C, H, W) -> (C, P); only the tiny N<->C transpose, pixels stay contiguous.
    x_cp = jnp.transpose(x_nchw, (1, 0, 2, 3)).reshape(C, P).astype(jnp.float32)
    x_cp = jnp.pad(x_cp, ((0, 0), (0, p_pad - P)))

    # ---- pass 1: batch statistics of y1 ------------------------------------
    params1 = jnp.concatenate([w1, b1], axis=1)               # (16, 4)
    stats_kernel = functools.partial(
        _stats_kernel, tile=tile, p_real=P, count0=min(tile, P), inv_p=1.0 / P)

    mean, var = pl.pallas_call(
        stats_kernel,
        out_shape=(jax.ShapeDtypeStruct((16, 1), jnp.float32),
                   jax.ShapeDtypeStruct((16, 1), jnp.float32)),
        grid_spec=pltpu.PrefetchScalarGridSpec(
            num_scalar_prefetch=0,
            grid=(num_tiles,),
            in_specs=[pl.BlockSpec((3, tile), lambda i: (0, i)),
                      pl.BlockSpec((16, 4), lambda i: (0, 0))],
            out_specs=[pl.BlockSpec((16, 1), lambda i: (0, 0)),
                       pl.BlockSpec((16, 1), lambda i: (0, 0))],
            scratch_shapes=[pltpu.VMEM((16, 1), jnp.float32),
                            pltpu.VMEM((16, 1), jnp.float32),
                            pltpu.VMEM((16, 1), jnp.float32)]),
        compiler_params=pltpu.CompilerParams(
            dimension_semantics=("arbitrary",)),      # sequential reduction
    )(x_cp, params1)

    # ---- fold BN (training-mode batch stats) into conv1 --------------------
    scale = gamma * lax.rsqrt(var + BN_EPS)                   # (16, 1)
    w1f = w1 * scale                                          # (16, 3)
    b1f = scale * (b1 - mean) + beta                          # (16, 1)
    params2 = jnp.concatenate(
        [w1f, b1f, w2, jnp.broadcast_to(b2, (16, 1))], axis=1)  # (16, 6)

    # ---- pass 2: fused per-pixel network ------------------------------------
    out = pl.pallas_call(
        _main_kernel,
        out_shape=jax.ShapeDtypeStruct((1, p_pad), jnp.float32),
        grid_spec=pltpu.PrefetchScalarGridSpec(
            num_scalar_prefetch=0,
            grid=(num_tiles,),
            in_specs=[pl.BlockSpec((3, tile), lambda i: (0, i)),
                      pl.BlockSpec((16, 6), lambda i: (0, 0))],
            out_specs=pl.BlockSpec((1, tile), lambda i: (0, i))),
        compiler_params=pltpu.CompilerParams(
            dimension_semantics=("parallel",)),       # independent pixel tiles
    )(x_cp, params2)

    return out.reshape(p_pad)[:P].reshape(N, 1, H, W)


def guide_nn_ref(x_nchw, params):
    """Pure-JAX reference (same math, straightforward) for a sanity check."""
    w1, b1, gamma, beta, w2, b2 = params
    N, C, H, W = x_nchw.shape
    x = jnp.transpose(x_nchw, (1, 0, 2, 3)).reshape(C, -1).astype(jnp.float32)
    y1 = w1 @ x + b1                                          # (16, P)
    mean = jnp.mean(y1, axis=1, keepdims=True)
    var = jnp.mean(jnp.square(y1 - mean), axis=1, keepdims=True)
    y1 = (y1 - mean) * lax.rsqrt(var + BN_EPS) * gamma + beta
    h = jnp.maximum(y1, 0.0)
    y2 = jnp.tanh(jnp.sum(w2 * h, axis=0, keepdims=True) + b2)  # (1, P)
    return y2.reshape(N, H, W)[:, None, :, :]


if __name__ == "__main__":
    key = jax.random.PRNGKey(0)
    x = jax.random.normal(key, (2, 3, 16, 16), jnp.float32)   # NCHW, 3 input channels
    params = init_params()

    out = jax.block_until_ready(guide_nn(x, params))
    assert out.shape == (2, 1, 16, 16), out.shape

    ref = guide_nn_ref(x, params)
    err = float(jnp.max(jnp.abs(out - ref)))
    assert err < 1e-4, err

    # TODO(synk): BatchNorm running_mean/running_var buffer updates (a training
    # side effect) are not produced; forward uses batch stats like PyTorch train mode.
    print("KERNEL_OK")
</pallas_src>

<mosaic_0001>
module attributes {stable_mosaic.version = 11 : i64} {
  func.func @_stats_kernel(%arg0: i32, %arg1: memref<3x512xf32, #tpu.memory_space<vmem>>, %arg2: memref<16x4xf32, #tpu.memory_space<vmem>>, %arg3: memref<16x1xf32, #tpu.memory_space<vmem>>, %arg4: memref<16x1xf32, #tpu.memory_space<vmem>>, %arg5: memref<16x1xf32, #tpu.memory_space<vmem>>, %arg6: memref<16x1xf32, #tpu.memory_space<vmem>>, %arg7: memref<16x1xf32, #tpu.memory_space<vmem>>) attributes {dimension_semantics = [#tpu.dimension_semantics<arbitrary>], iteration_bounds = array<i64: 1>, scalar_prefetch = 0 : i64, scratch_operands = 3 : i64, tpu.core_type = #tpu.core_type<tc>, window_params = [{transform_indices = @transform_0, window_bounds = array<i64: 3, 512>}, {pipeline_mode = #tpu.pipeline_mode<synchronous>, transform_indices = @transform_1, window_bounds = array<i64: 16, 4>}, {pipeline_mode = #tpu.pipeline_mode<synchronous>, transform_indices = @transform_2, window_bounds = array<i64: 16, 1>}, {pipeline_mode = #tpu.pipeline_mode<synchronous>, transform_indices = @transform_3, window_bounds = array<i64: 16, 1>}]} {
    %c0 = arith.constant 0 : index
    %c0_0 = arith.constant 0 : index
    %0 = vector.load %arg1[%c0, %c0_0] : memref<3x512xf32, #tpu.memory_space<vmem>>, vector<3x512xf32>
    %c0_1 = arith.constant 0 : index
    %c0_2 = arith.constant 0 : index
    %1 = vector.load %arg2[%c0_1, %c0_2] : memref<16x4xf32, #tpu.memory_space<vmem>>, vector<16x4xf32>
    %2 = vector.extract_strided_slice %1 {offsets = [0, 0], sizes = [16, 3], strides = [1, 1]} : vector<16x4xf32> to vector<16x3xf32>
    %3 = vector.extract_strided_slice %1 {offsets = [0, 3], sizes = [16, 1], strides = [1, 1]} : vector<16x4xf32> to vector<16x1xf32>
    %4 = vector.extract_strided_slice %2 {offsets = [0, 0], sizes = [16, 1], strides = [1, 1]} : vector<16x3xf32> to vector<16x1xf32>
    %5 = vector.extract_strided_slice %0 {offsets = [0, 0], sizes = [1, 512], strides = [1, 1]} : vector<3x512xf32> to vector<1x512xf32>
    %6 = vector.broadcast %4 : vector<16x1xf32> to vector<16x512xf32>
    %7 = vector.broadcast %5 : vector<1x512xf32> to vector<16x512xf32>
    %8 = arith.mulf %6, %7 : vector<16x512xf32>
    %9 = vector.extract_strided_slice %2 {offsets = [0, 1], sizes = [16, 1], strides = [1, 1]} : vector<16x3xf32> to vector<16x1xf32>
    %10 = vector.extract_strided_slice %0 {offsets = [1, 0], sizes = [1, 512], strides = [1, 1]} : vector<3x512xf32> to vector<1x512xf32>
    %11 = vector.broadcast %9 : vector<16x1xf32> to vector<16x512xf32>
    %12 = vector.broadcast %10 : vector<1x512xf32> to vector<16x512xf32>
    %13 = arith.mulf %11, %12 : vector<16x512xf32>
    %14 = arith.addf %8, %13 : vector<16x512xf32>
    %15 = vector.extract_strided_slice %2 {offsets = [0, 2], sizes = [16, 1], strides = [1, 1]} : vector<16x3xf32> to vector<16x1xf32>
    %16 = vector.extract_strided_slice %0 {offsets = [2, 0], sizes = [1, 512], strides = [1, 1]} : vector<3x512xf32> to vector<1x512xf32>
    %17 = vector.broadcast %15 : vector<16x1xf32> to vector<16x512xf32>
    %18 = vector.broadcast %16 : vector<1x512xf32> to vector<16x512xf32>
    %19 = arith.mulf %17, %18 : vector<16x512xf32>
    %20 = arith.addf %14, %19 : vector<16x512xf32>
    %21 = vector.broadcast %3 : vector<16x1xf32> to vector<16x512xf32>
    %22 = arith.addf %20, %21 : vector<16x512xf32>
    %23 = tpu.iota {dimensions = array<i32: 1>} : vector<1x512xi32>
    %c512_i32 = arith.constant 512 : i32
    %24 = arith.muli %arg0, %c512_i32 : i32
    %25 = vector.broadcast %24 : i32 to vector<1x512xi32>
    %26 = arith.addi %23, %25 : vector<1x512xi32>
    %c512_i32_3 = arith.constant 512 : i32
    %27 = vector.broadcast %c512_i32_3 : i32 to vector<1x512xi32>
    %28 = arith.cmpi slt, %26, %27 : vector<1x512xi32>
    %c0_i32 = arith.constant 0 : i32
    %29 = arith.cmpi eq, %arg0, %c0_i32 : i32
    %30 = arith.extui %29 : i1 to i32
    %c0_i32_4 = arith.constant 0 : i32
    %31 = arith.cmpi ne, %30, %c0_i32_4 : i32
    scf.if %31 {
      %cst_19 = arith.constant 0.000000e+00 : f32
      %53 = vector.shape_cast %28 : vector<1x512xi1> to vector<1x512xi1>
      %54 = vector.broadcast %53 : vector<1x512xi1> to vector<16x512xi1>
      %55 = vector.broadcast %cst_19 : f32 to vector<16x512xf32>
      %56 = arith.select %54, %22, %55 : vector<16x512xi1>, vector<16x512xf32>
      %cst_20 = arith.constant dense<0.000000e+00> : vector<16xf32>
      %57 = vector.multi_reduction <add>, %56, %cst_20 [1] : vector<16x512xf32> to vector<16xf32>
      %58 = vector.shape_cast %57 : vector<16xf32> to vector<16x1xf32>
      %cst_21 = arith.constant 0.001953125 : f32
      %59 = vector.broadcast %cst_21 : f32 to vector<16x1xf32>
      %60 = arith.mulf %58, %59 : vector<16x1xf32>
      %c0_22 = arith.constant 0 : index
      %c0_23 = arith.constant 0 : index
      %61 = vector.load %arg5[%c0_22, %c0_23] : memref<16x1xf32, #tpu.memory_space<vmem>>, vector<16x1xf32>
      tpu.vector_store %arg5[%c0_22, %c0_23], %60 {strides = array<i32>} : memref<16x1xf32, #tpu.memory_space<vmem>>, vector<16x1xf32>,
      %cst_24 = arith.constant 0.000000e+00 : f32
      %62 = vector.broadcast %cst_24 : f32 to vector<16x1xf32>
      %c0_25 = arith.constant 0 : index
      %c0_26 = arith.constant 0 : index
      %63 = vector.load %arg6[%c0_25, %c0_26] : memref<16x1xf32, #tpu.memory_space<vmem>>, vector<16x1xf32>
      tpu.vector_store %arg6[%c0_25, %c0_26], %62 {strides = array<i32>} : memref<16x1xf32, #tpu.memory_space<vmem>>, vector<16x1xf32>,
      %cst_27 = arith.constant 0.000000e+00 : f32
      %64 = vector.broadcast %cst_27 : f32 to vector<16x1xf32>
      %c0_28 = arith.constant 0 : index
      %c0_29 = arith.constant 0 : index
      %65 = vector.load %arg7[%c0_28, %c0_29] : memref<16x1xf32, #tpu.memory_space<vmem>>, vector<16x1xf32>
      tpu.vector_store %arg7[%c0_28, %c0_29], %64 {strides = array<i32>} : memref<16x1xf32, #tpu.memory_space<vmem>>, vector<16x1xf32>,
    } else {
    }
    %c0_5 = arith.constant 0 : index
    %c0_6 = arith.constant 0 : index
    %32 = vector.load %arg5[%c0_5, %c0_6] : memref<16x1xf32, #tpu.memory_space<vmem>>, vector<16x1xf32>
    %33 = vector.broadcast %32 : vector<16x1xf32> to vector<16x512xf32>
    %34 = arith.subf %22, %33 : vector<16x512xf32>
    %cst = arith.constant 0.000000e+00 : f32
    %35 = vector.shape_cast %28 : vector<1x512xi1> to vector<1x512xi1>
    %36 = vector.broadcast %35 : vector<1x512xi1> to vector<16x512xi1>
    %37 = vector.broadcast %cst : f32 to vector<16x512xf32>
    %38 = arith.select %36, %34, %37 : vector<16x512xi1>, vector<16x512xf32>
    %c0_7 = arith.constant 0 : index
    %c0_8 = arith.constant 0 : index
    %39 = vector.load %arg6[%c0_7, %c0_8] : memref<16x1xf32, #tpu.memory_space<vmem>>, vector<16x1xf32>
    %cst_9 = arith.constant dense<0.000000e+00> : vector<16xf32>
    %40 = vector.multi_reduction <add>, %38, %cst_9 [1] : vector<16x512xf32> to vector<16xf32>
    %41 = vector.shape_cast %40 : vector<16xf32> to vector<16x1xf32>
    %42 = arith.addf %39, %41 : vector<16x1xf32>
    %c0_10 = arith.constant 0 : index
    %c0_11 = arith.constant 0 : index
    %43 = vector.load %arg6[%c0_10, %c0_11] : memref<16x1xf32, #tpu.memory_space<vmem>>, vector<16x1xf32>
    tpu.vector_store %arg6[%c0_10, %c0_11], %42 {strides = array<i32>} : memref<16x1xf32, #tpu.memory_space<vmem>>, vector<16x1xf32>,
    %c0_12 = arith.constant 0 : index
    %c0_13 = arith.constant 0 : index
    %44 = vector.load %arg7[%c0_12, %c0_13] : memref<16x1xf32, #tpu.memory_space<vmem>>, vector<16x1xf32>
    %45 = arith.mulf %38, %38 : vector<16x512xf32>
    %cst_14 = arith.constant dense<0.000000e+00> : vector<16xf32>
    %46 = vector.multi_reduction <add>, %45, %cst_14 [1] : vector<16x512xf32> to vector<16xf32>
    %47 = vector.shape_cast %46 : vector<16xf32> to vector<16x1xf32>
    %48 = arith.addf %44, %47 : vector<16x1xf32>
    %c0_15 = arith.constant 0 : index
    %c0_16 = arith.constant 0 : index
    %49 = vector.load %arg7[%c0_15, %c0_16] : memref<16x1xf32, #tpu.memory_space<vmem>>, vector<16x1xf32>
    tpu.vector_store %arg7[%c0_15, %c0_16], %48 {strides = array<i32>} : memref<16x1xf32, #tpu.memory_space<vmem>>, vector<16x1xf32>,
    %c0_i32_17 = arith.constant 0 : i32
    %50 = arith.cmpi eq, %arg0, %c0_i32_17 : i32
    %51 = arith.extui %50 : i1 to i32
    %c0_i32_18 = arith.constant 0 : i32
    %52 = arith.cmpi ne, %51, %c0_i32_18 : i32
    scf.if %52 {
      %c0_19 = arith.constant 0 : index
      %c0_20 = arith.constant 0 : index
      %53 = vector.load %arg6[%c0_19, %c0_20] : memref<16x1xf32, #tpu.memory_space<vmem>>, vector<16x1xf32>
      %cst_21 = arith.constant 0.001953125 : f32
      %54 = vector.broadcast %cst_21 : f32 to vector<16x1xf32>
      %55 = arith.mulf %53, %54 : vector<16x1xf32>
      %c0_22 = arith.constant 0 : index
      %c0_23 = arith.constant 0 : index
      %56 = vector.load %arg5[%c0_22, %c0_23] : memref<16x1xf32, #tpu.memory_space<vmem>>, vector<16x1xf32>
      %57 = arith.addf %56, %55 : vector<16x1xf32>
      %c0_24 = arith.constant 0 : index
      %c0_25 = arith.constant 0 : index
      %58 = vector.load %arg3[%c0_24, %c0_25] : memref<16x1xf32, #tpu.memory_space<vmem>>, vector<16x1xf32>
      tpu.vector_store %arg3[%c0_24, %c0_25], %57 {strides = array<i32>} : memref<16x1xf32, #tpu.memory_space<vmem>>, vector<16x1xf32>,
      %c0_26 = arith.constant 0 : index
      %c0_27 = arith.constant 0 : index
      %59 = vector.load %arg7[%c0_26, %c0_27] : memref<16x1xf32, #tpu.memory_space<vmem>>, vector<16x1xf32>
      %cst_28 = arith.constant 0.001953125 : f32
      %60 = vector.broadcast %cst_28 : f32 to vector<16x1xf32>
      %61 = arith.mulf %59, %60 : vector<16x1xf32>
      %62 = arith.mulf %55, %55 : vector<16x1xf32>
      %63 = arith.subf %61, %62 : vector<16x1xf32>
      %c0_29 = arith.constant 0 : index
      %c0_30 = arith.constant 0 : index
      %64 = vector.load %arg4[%c0_29, %c0_30] : memref<16x1xf32, #tpu.memory_space<vmem>>, vector<16x1xf32>
      tpu.vector_store %arg4[%c0_29, %c0_30], %63 {strides = array<i32>} : memref<16x1xf32, #tpu.memory_space<vmem>>, vector<16x1xf32>,
    } else {
    }
    return
  }
  func.func @transform_0(%arg0: i32) -> (i32, i32) {
    %c0_i32 = arith.constant 0 : i32
    %c0_i32_0 = arith.constant 0 : i32
    return %c0_i32, %arg0 : i32, i32
  }
  func.func @transform_1(%arg0: i32) -> (i32, i32) {
    %c0_i32 = arith.constant 0 : i32
    %c0_i32_0 = arith.constant 0 : i32
    %c0_i32_1 = arith.constant 0 : i32
    return %c0_i32, %c0_i32_0 : i32, i32
  }
  func.func @transform_2(%arg0: i32) -> (i32, i32) {
    %c0_i32 = arith.constant 0 : i32
    %c0_i32_0 = arith.constant 0 : i32
    %c0_i32_1 = arith.constant 0 : i32
    return %c0_i32, %c0_i32_0 : i32, i32
  }
  func.func @transform_3(%arg0: i32) -> (i32, i32) {
    %c0_i32 = arith.constant 0 : i32
    %c0_i32_0 = arith.constant 0 : i32
    %c0_i32_1 = arith.constant 0 : i32
    return %c0_i32, %c0_i32_0 : i32, i32
  }
}

module attributes {stable_mosaic.version = 11 : i64} {
  func.func @_main_kernel(%arg0: i32, %arg1: memref<3x512xf32, #tpu.memory_space<vmem>>, %arg2: memref<16x6xf32, #tpu.memory_space<vmem>>, %arg3: memref<1x512xf32, #tpu.memory_space<vmem>>) attributes {dimension_semantics = [#tpu.dimension_semantics<parallel>], iteration_bounds = array<i64: 1>, scalar_prefetch = 0 : i64, scratch_operands = 0 : i64, tpu.core_type = #tpu.core_type<tc>, window_params = [{transform_indices = @transform_0, window_bounds = array<i64: 3, 512>}, {pipeline_mode = #tpu.pipeline_mode<synchronous>, transform_indices = @transform_1, window_bounds = array<i64: 16, 6>}, {transform_indices = @transform_2, window_bounds = array<i64: 1, 512>}]} {
    %c0 = arith.constant 0 : index
    %c0_0 = arith.constant 0 : index
    %0 = vector.load %arg1[%c0, %c0_0] : memref<3x512xf32, #tpu.memory_space<vmem>>, vector<3x512xf32>
    %c0_1 = arith.constant 0 : index
    %c0_2 = arith.constant 0 : index
    %1 = vector.load %arg2[%c0_1, %c0_2] : memref<16x6xf32, #tpu.memory_space<vmem>>, vector<16x6xf32>
    %2 = vector.extract_strided_slice %1 {offsets = [0, 0], sizes = [16, 3], strides = [1, 1]} : vector<16x6xf32> to vector<16x3xf32>
    %3 = vector.extract_strided_slice %1 {offsets = [0, 3], sizes = [16, 1], strides = [1, 1]} : vector<16x6xf32> to vector<16x1xf32>
    %4 = vector.extract_strided_slice %1 {offsets = [0, 4], sizes = [16, 1], strides = [1, 1]} : vector<16x6xf32> to vector<16x1xf32>
    %5 = vector.extract_strided_slice %1 {offsets = [0, 5], sizes = [1, 1], strides = [1, 1]} : vector<16x6xf32> to vector<1x1xf32>
    %6 = vector.extract_strided_slice %2 {offsets = [0, 0], sizes = [16, 1], strides = [1, 1]} : vector<16x3xf32> to vector<16x1xf32>
    %7 = vector.extract_strided_slice %0 {offsets = [0, 0], sizes = [1, 512], strides = [1, 1]} : vector<3x512xf32> to vector<1x512xf32>
    %8 = vector.broadcast %6 : vector<16x1xf32> to vector<16x512xf32>
    %9 = vector.broadcast %7 : vector<1x512xf32> to vector<16x512xf32>
    %10 = arith.mulf %8, %9 : vector<16x512xf32>
    %11 = vector.extract_strided_slice %2 {offsets = [0, 1], sizes = [16, 1], strides = [1, 1]} : vector<16x3xf32> to vector<16x1xf32>
    %12 = vector.extract_strided_slice %0 {offsets = [1, 0], sizes = [1, 512], strides = [1, 1]} : vector<3x512xf32> to vector<1x512xf32>
    %13 = vector.broadcast %11 : vector<16x1xf32> to vector<16x512xf32>
    %14 = vector.broadcast %12 : vector<1x512xf32> to vector<16x512xf32>
    %15 = arith.mulf %13, %14 : vector<16x512xf32>
    %16 = arith.addf %10, %15 : vector<16x512xf32>
    %17 = vector.extract_strided_slice %2 {offsets = [0, 2], sizes = [16, 1], strides = [1, 1]} : vector<16x3xf32> to vector<16x1xf32>
    %18 = vector.extract_strided_slice %0 {offsets = [2, 0], sizes = [1, 512], strides = [1, 1]} : vector<3x512xf32> to vector<1x512xf32>
    %19 = vector.broadcast %17 : vector<16x1xf32> to vector<16x512xf32>
    %20 = vector.broadcast %18 : vector<1x512xf32> to vector<16x512xf32>
    %21 = arith.mulf %19, %20 : vector<16x512xf32>
    %22 = arith.addf %16, %21 : vector<16x512xf32>
    %23 = vector.broadcast %3 : vector<16x1xf32> to vector<16x512xf32>
    %24 = arith.addf %22, %23 : vector<16x512xf32>
    %cst = arith.constant 0.000000e+00 : f32
    %25 = vector.broadcast %cst : f32 to vector<16x512xf32>
    %26 = arith.maximumf %24, %25 : vector<16x512xf32>
    %27 = vector.broadcast %4 : vector<16x1xf32> to vector<16x512xf32>
    %28 = arith.mulf %27, %26 : vector<16x512xf32>
    %cst_3 = arith.constant dense<0.000000e+00> : vector<512xf32>
    %29 = vector.multi_reduction <add>, %28, %cst_3 [0] : vector<16x512xf32> to vector<512xf32>
    %30 = vector.shape_cast %29 : vector<512xf32> to vector<1x512xf32>
    %31 = vector.broadcast %5 : vector<1x1xf32> to vector<1x512xf32>
    %32 = arith.addf %30, %31 : vector<1x512xf32>
    %33 = math.tanh %32 : vector<1x512xf32>
    %c0_4 = arith.constant 0 : index
    %c0_5 = arith.constant 0 : index
    %34 = vector.load %arg3[%c0_4, %c0_5] : memref<1x512xf32, #tpu.memory_space<vmem>>, vector<1x512xf32>
    tpu.vector_store %arg3[%c0_4, %c0_5], %33 {strides = array<i32>} : memref<1x512xf32, #tpu.memory_space<vmem>>, vector<1x512xf32>,
    return
  }
  func.func @transform_0(%arg0: i32) -> (i32, i32) {
    %c0_i32 = arith.constant 0 : i32
    %c0_i32_0 = arith.constant 0 : i32
    return %c0_i32, %arg0 : i32, i32
  }
  func.func @transform_1(%arg0: i32) -> (i32, i32) {
    %c0_i32 = arith.constant 0 : i32
    %c0_i32_0 = arith.constant 0 : i32
    %c0_i32_1 = arith.constant 0 : i32
    return %c0_i32, %c0_i32_0 : i32, i32
  }
  func.func @transform_2(%arg0: i32) -> (i32, i32) {
    %c0_i32 = arith.constant 0 : i32
    %c0_i32_0 = arith.constant 0 : i32
    return %c0_i32, %arg0 : i32, i32
  }
}

</mosaic_0001>

<bundles_post_ra>
// kernel: guide_nn.3
= control target key start
LH: loop header
LB: loop body
LE: loop exit
PB: predicated region body
PF: predicated region fallthrough
CT: control target
= control target key end

     0   :  { %v332_v0 = vmov 1   ;;  %v333_v1 = vmov 0   ;;  %v334_v4 = vmov 2   ;;  %v335_v5 = vmov 3   ;;  %s380_s1 = inlined_call_operand.vmem [shape: f32[16,6], index: 1, kind: input, shape index: {}]   ;;  %s381_s0 = inlined_call_operand.vmem [shape: f32[3,512], index: 0, kind: input, shape index: {}]   ;;  %s382_s2 = inlined_call_operand.vmem [shape: f32[1,512], index: 2, kind: output, shape index: {}]  }
   0x1   :  { %317 = vset.pattern.permute.xlu1 %v332_v0  ;;  %316 = vset.pattern.permute.xlu0 %v333_v1  ;;  %v13_v2 = vld [vmem:[%s380_s1] sm:$0xff]  ;;  %v14_v3 = vld [vmem:[%s380_s1 + $0x8] sm:$0xff]  ;;  %v336_v6 = vmov 4   ;;  %v337_v7 = vmov 5   ;;  %v27_v8 = vlaneseq }
   0x2   :  { %72 = vperm.xlu1 %317, %v13_v2   ;;  %17 = vperm.xlu0 %316, %v13_v2   ;;  %v11_v12 = vld [vmem:[%s381_s0] sm:$0x77]  ;;  %v12_v13 = vld [vmem:[%s381_s0 + $0x8] sm:$0x77] }
   0x3   :  { %v361_v9 = vshrl.u32 %v27_v8, 7  ;;  %vm302_vm0 = vcmp.lt.s32.totalorder %v27_v8, 512 }
   0x5   :  { %v81_v10 = vsub.s32 1, %v361_v9  ;;  %v85_v11 = vsub.s32 5, %v361_v9  ;;  %v29_v14 = vsub.s32 0, %v361_v9  ;;  %v33_v15 = vsub.s32 4, %v361_v9 }
   0x6   :  { %76 = vperm.xlu1 %317, %v14_v3   ;;  %22 = vperm.xlu0 %316, %v14_v3   ;;  %v141_v24 = vsub.s32 2, %v361_v9  ;;  %v145_v25 = vsub.s32 6, %v361_v9 }
   0x7   :  { %v82_v16 = vrot.slane %v11_v12, %v81_v10  ;;  %v86_v17 = vrot.slane %v11_v12, %v85_v11  ;;  %v90_v18 = vrot.slane %v12_v13, %v81_v10  ;;  %v94_v19 = vrot.slane %v12_v13, %v85_v11 }
   0x8   :  { %v30_v20 = vrot.slane %v11_v12, %v29_v14  ;;  %v34_v21 = vrot.slane %v11_v12, %v33_v15  ;;  %v38_v22 = vrot.slane %v12_v13, %v29_v14  ;;  %v42_v23 = vrot.slane %v12_v13, %v33_v15 }
   0x9   :  { %v102_v27 = vrot.slane %v82_v16, %v81_v10  ;;  %v106_v28 = vrot.slane %v86_v17, %v81_v10  ;;  %v110_v29 = vrot.slane %v90_v18, %v81_v10  ;;  %v114_v30 = vrot.slane %v94_v19, %v81_v10 }
   0xa   :  { %319 = vset.pattern.permute.xlu1 %v334_v4  ;;  %318 = vset.pattern.permute.xlu0 %v334_v4  ;;  %v50_v32 = vrot.slane %v30_v20, %v29_v14  ;;  %v54_v33 = vrot.slane %v34_v21, %v29_v14  ;;  %v58_v34 = vrot.slane %v38_v22, %v29_v14 }
   0xb   :  { %136 = vperm.xlu1 %319, %v14_v3   ;;  %132 = vperm.xlu0 %318, %v13_v2   ;;  %v62_v35 = vrot.slane %v42_v23, %v29_v14  ;;  %v142_v36 = vrot.slane %v11_v12, %v141_v24  ;;  %v146_v37 = vrot.slane %v11_v12, %v145_v25 }
   0xc   :  { %v150_v38 = vrot.slane %v12_v13, %v141_v24  ;;  %v154_v39 = vrot.slane %v12_v13, %v145_v25 }
   0xd   :  { %v162_v50 = vrot.slane %v142_v36, %v141_v24  ;;  %v166_v51 = vrot.slane %v146_v37, %v141_v24 }
   0xe   :  { %v170_v52 = vrot.slane %v150_v38, %v141_v24  ;;  %v174_v53 = vrot.slane %v154_v39, %v141_v24 }
   0xf   :  { %320 = vset.pattern.permute.xlu1 %v335_v5  ;;  %321 = vset.pattern.permute.xlu0 %v335_v5 }
  0x10   :  { %192 = vperm.xlu1 %320, %v13_v2   ;;  %196 = vperm.xlu0 %321, %v14_v3  }
  0x14   :  { %322 = vset.pattern.permute.xlu1 %v336_v6  ;;  %323 = vset.pattern.permute.xlu0 %v337_v7 }
  0x15   :  { %216 = vperm.xlu1 %322, %v13_v2   ;;  %260 = vperm.xlu0 %323, %v13_v2  }
  0x19   :  { %220 = vperm.xlu1 %322, %v14_v3  }
  0x81   :  { %v73_v26 = vpop.permute.xlu1 %72  ;;  %v18_v31 = vpop.permute.xlu0 %17 }
  0x82   :  { %v115_v40 = vmul.f32 %v102_v27, %v73_v26  ;;  %v116_v41 = vmul.f32 %v106_v28, %v73_v26  ;;  %v117_v42 = vmul.f32 %v110_v29, %v73_v26  ;;  %v118_v43 = vmul.f32 %v114_v30, %v73_v26 }
  0x83   :  { %v63_v46 = vmul.f32 %v50_v32, %v18_v31  ;;  %v64_v47 = vmul.f32 %v54_v33, %v18_v31  ;;  %v65_v48 = vmul.f32 %v58_v34, %v18_v31  ;;  %v66_v49 = vmul.f32 %v62_v35, %v18_v31 }
  0x85   :  { %v77_v44 = vpop.permute.xlu1 %76  ;;  %v23_v45 = vpop.permute.xlu0 %22  ;;  %v123_v62 = vadd.f32 %v115_v40, %v63_v46  ;;  %v124_v63 = vadd.f32 %v116_v41, %v64_v47  ;;  %v125_v0 = vadd.f32 %v117_v42, %v65_v48  ;;  %v126_v1 = vadd.f32 %v118_v43, %v66_v49 }
  0x86   :  { %v119_v54 = vmul.f32 %v102_v27, %v77_v44  ;;  %v120_v55 = vmul.f32 %v106_v28, %v77_v44  ;;  %v121_v56 = vmul.f32 %v110_v29, %v77_v44  ;;  %v122_v57 = vmul.f32 %v114_v30, %v77_v44 }
  0x87   :  { %v67_v58 = vmul.f32 %v50_v32, %v23_v45  ;;  %v68_v59 = vmul.f32 %v54_v33, %v23_v45  ;;  %v69_v60 = vmul.f32 %v58_v34, %v23_v45  ;;  %v70_v61 = vmul.f32 %v62_v35, %v23_v45 }
  0x89   :  { %v127_v14 = vadd.f32 %v119_v54, %v67_v58  ;;  %v128_v15 = vadd.f32 %v120_v55, %v68_v59  ;;  %v129_v16 = vadd.f32 %v121_v56, %v69_v60  ;;  %v130_v17 = vadd.f32 %v122_v57, %v70_v61 }
  0x8a   :  { %v137_v2 = vpop.permute.xlu1 %136  ;;  %v133_v3 = vpop.permute.xlu0 %132 }
  0x8b   :  { %v179_v4 = vmul.f32 %v162_v50, %v137_v2  ;;  %v180_v5 = vmul.f32 %v166_v51, %v137_v2  ;;  %v181_v6 = vmul.f32 %v170_v52, %v137_v2  ;;  %v182_v7 = vmul.f32 %v174_v53, %v137_v2 }
  0x8c   :  { %v175_v10 = vmul.f32 %v162_v50, %v133_v3  ;;  %v176_v11 = vmul.f32 %v166_v51, %v133_v3  ;;  %v177_v12 = vmul.f32 %v170_v52, %v133_v3  ;;  %v178_v13 = vmul.f32 %v174_v53, %v133_v3 }
  0x8d   :  { %v187_v23 = vadd.f32 %v179_v4, %v127_v14  ;;  %v188_v24 = vadd.f32 %v180_v5, %v128_v15  ;;  %v189_v25 = vadd.f32 %v181_v6, %v129_v16  ;;  %v190_v26 = vadd.f32 %v182_v7, %v130_v17 }
  0x8e   :  { %v183_v18 = vadd.f32 %v175_v10, %v123_v62  ;;  %v184_v19 = vadd.f32 %v176_v11, %v124_v63  ;;  %v185_v20 = vadd.f32 %v177_v12, %v125_v0  ;;  %v186_v21 = vadd.f32 %v178_v13, %v126_v1 }
  0x8f   :  { %v193_v22 = vpop.permute.xlu1 %192  ;;  %v197_v31 = vpop.permute.xlu0 %196 }
  0x90   :  { %v199_v27 = vadd.f32 %v193_v22, %v183_v18  ;;  %v200_v28 = vadd.f32 %v193_v22, %v184_v19  ;;  %v201_v29 = vadd.f32 %v193_v22, %v185_v20  ;;  %v202_v30 = vadd.f32 %v193_v22, %v186_v21 }
  0x91   :  { %v203_v32 = vadd.f32 %v197_v31, %v187_v23  ;;  %v204_v33 = vadd.f32 %v197_v31, %v188_v24  ;;  %v205_v34 = vadd.f32 %v197_v31, %v189_v25  ;;  %v206_v35 = vadd.f32 %v197_v31, %v190_v26 }
  0x92   :  { %v207_v36 = vmax.f32 %v199_v27, 0.0  ;;  %v208_v37 = vmax.f32 %v200_v28, 0.0  ;;  %v209_v38 = vmax.f32 %v201_v29, 0.0  ;;  %v210_v39 = vmax.f32 %v202_v30, 0.0 }
  0x93   :  { %v211_v41 = vmax.f32 %v203_v32, 0.0  ;;  %v212_v42 = vmax.f32 %v204_v33, 0.0  ;;  %v213_v43 = vmax.f32 %v205_v34, 0.0  ;;  %v214_v44 = vmax.f32 %v206_v35, 0.0 }
  0x94   :  { %v217_v40 = vpop.permute.xlu1 %216  ;;  %v261_v16 = vpop.permute.xlu0 %260  ;;  %v338_v25 = vmov 1966171168  }
  0x95   :  { %v223_v45 = vmul.f32 %v217_v40, %v207_v36  ;;  %v224_v46 = vmul.f32 %v217_v40, %v208_v37  ;;  %v225_v47 = vmul.f32 %v217_v40, %v209_v38  ;;  %v226_v48 = vmul.f32 %v217_v40, %v210_v39 }
  0x96   :  { %v278_v26 = vunpack.c.l.s4 %v338_v25 }
  0x98   :  { %v221_v49 = vpop.permute.xlu1 %220  ;;  %v279_v27 = vunpack.c.0.s8 %v278_v26 }
  0x99   :  { %v227_v50 = vmul.f32 %v221_v49, %v211_v41  ;;  %v228_v51 = vmul.f32 %v221_v49, %v212_v42  ;;  %v229_v52 = vmul.f32 %v221_v49, %v213_v43  ;;  %v230_v53 = vmul.f32 %v221_v49, %v214_v44 }
  0x9a   :  { %v282_v29 = vsub.s32 %v279_v27, %v361_v9 }
  0x9b   :  { %v231_v54 = vadd.f32 %v227_v50, %v223_v45  ;;  %v238_v55 = vadd.f32 %v228_v51, %v224_v46  ;;  %v245_v56 = vadd.f32 %v229_v52, %v225_v47  ;;  %v252_v57 = vadd.f32 %v230_v53, %v226_v48 }
  0x9d   :  { %v232_v58 = vrot.slane %v231_v54, 4  ;;  %v239_v59 = vrot.slane %v238_v55, 4  ;;  %v246_v60 = vrot.slane %v245_v56, 4  ;;  %v253_v61 = vrot.slane %v252_v57, 4 }
  0x9f   :  { %v233_v62 = vadd.f32 %v232_v58, %v231_v54  ;;  %v240_v63 = vadd.f32 %v239_v59, %v238_v55  ;;  %v247_v0 = vadd.f32 %v246_v60, %v245_v56  ;;  %v254_v1 = vadd.f32 %v253_v61, %v252_v57 }
  0xa1   :  { %v234_v2 = vrot.slane %v233_v62, 2  ;;  %v241_v3 = vrot.slane %v240_v63, 2  ;;  %v248_v4 = vrot.slane %v247_v0, 2  ;;  %v255_v5 = vrot.slane %v254_v1, 2 }
  0xa3   :  { %v235_v6 = vadd.f32 %v234_v2, %v233_v62  ;;  %v242_v7 = vadd.f32 %v241_v3, %v240_v63  ;;  %v249_v10 = vadd.f32 %v248_v4, %v247_v0  ;;  %v256_v11 = vadd.f32 %v255_v5, %v254_v1 }
  0xa5   :  { %v236_v12 = vrot.slane %v235_v6, 1  ;;  %v243_v13 = vrot.slane %v242_v7, 1  ;;  %v250_v14 = vrot.slane %v249_v10, 1  ;;  %v257_v15 = vrot.slane %v256_v11, 1 }
  0xa7   :  { %v237_v17 = vadd.f32 %v236_v12, %v235_v6  ;;  %v244_v18 = vadd.f32 %v243_v13, %v242_v7  ;;  %v251_v19 = vadd.f32 %v250_v14, %v249_v10  ;;  %v258_v20 = vadd.f32 %v257_v15, %v256_v11 }
  0xa9   :  { %v263_v21 = vadd.f32 %v261_v16, %v237_v17  ;;  %v264_v22 = vadd.f32 %v261_v16, %v244_v18  ;;  %v265_v23 = vadd.f32 %v261_v16, %v251_v19  ;;  %v266_v24 = vadd.f32 %v261_v16, %v258_v20 }
  0xab   :  { %324 = vtanh.f32 %v263_v21 }
  0xac   :  { %326 = vtanh.f32 %v264_v22 }
  0xad   :  { %328 = vtanh.f32 %v265_v23 }
  0xae   :  { %330 = vtanh.f32 %v266_v24 }
  0xb5   :  { %v325_v28 = vpop.eup %324 }
  0xb6   :  { %v327_v30 = vpop.eup %326 }
  0xb7   :  { %v329_v31 = vpop.eup %328  ;;  %v275_v32 = vcombine.low %v325_v28, %v327_v30 }
  0xb8   :  { %v331_v33 = vpop.eup %330 }
  0xb9   :  { %v276_v34 = vcombine.low %v329_v31, %v331_v33  ;;  %v283_v35 = vrot.slane %v275_v32, %v282_v29 }
  0xbb   :  { %v290_v36 = vrot.slane %v276_v34, %v282_v29 }
  0xbd   :  { %v291_v37 = vcombine.low %v283_v35, %v290_v36 }
  0xbf   :  { %v298_v38 = vrot.slane %v291_v37, %v282_v29 }
  0xc1   :  { %304 = vst.msk [vmem:[%s382_s2] sm:$0xf] %vm302_vm0, %v298_v38 }

// kernel: guide_nn.2
= control target key start
LH: loop header
LB: loop body
LE: loop exit
PB: predicated region body
PF: predicated region fallthrough
CT: control target
= control target key end

     0   :  { %v384_v0 = vmov 1   ;;  %v385_v1 = vmov 0   ;;  %v386_v4 = vmov 2   ;;  %v387_v5 = vmov 3   ;;  %s455_s1 = inlined_call_operand.vmem [shape: f32[16,4], index: 1, kind: input, shape index: {}]   ;;  %s456_s0 = inlined_call_operand.vmem [shape: f32[3,512], index: 0, kind: input, shape index: {}]   ;;  %s457_s2 = inlined_call_operand.vmem [shape: f32[16,1], index: 2, kind: output, shape index: {0}]   ;;  %s458_s3 = inlined_call_operand.vmem [shape: f32[16,1], index: 3, kind: output, shape index: {1}]  }
   0x1   :  { %377 = vset.pattern.permute.xlu1 %v384_v0  ;;  %376 = vset.pattern.permute.xlu0 %v385_v1  ;;  %v15_v2 = vld [vmem:[%s455_s1] sm:$0xff]  ;;  %v16_v3 = vld [vmem:[%s455_s1 + $0x8] sm:$0xff]  ;;  %v29_v6 = vlaneseq  ;;  %vm256_vm0 = vcmask 7168  }
   0x2   :  { %74 = vperm.xlu1 %377, %v15_v2   ;;  %19 = vperm.xlu0 %376, %v15_v2   ;;  %v13_v10 = vld [vmem:[%s456_s0] sm:$0x77]  ;;  %v14_v13 = vld [vmem:[%s456_s0 + $0x8] sm:$0x77] }
   0x3   :  { %v30_v7 = vshrl.u32 %v29_v6, 7 }
   0x5   :  { %v83_v8 = vsub.s32 1, %v30_v7  ;;  %v87_v9 = vsub.s32 5, %v30_v7  ;;  %v31_v11 = vsub.s32 0, %v30_v7  ;;  %v35_v12 = vsub.s32 4, %v30_v7 }
   0x6   :  { %78 = vperm.xlu1 %377, %v16_v3   ;;  %24 = vperm.xlu0 %376, %v16_v3   ;;  %v143_v15 = vsub.s32 2, %v30_v7  ;;  %v147_v16 = vsub.s32 6, %v30_v7 }
   0x7   :  { %v84_v14 = vrot.slane %v13_v10, %v83_v8  ;;  %v88_v17 = vrot.slane %v13_v10, %v87_v9  ;;  %v92_v18 = vrot.slane %v14_v13, %v83_v8  ;;  %v32_v19 = vrot.slane %v13_v10, %v31_v11 }
   0x8   :  { %v36_v20 = vrot.slane %v13_v10, %v35_v12  ;;  %v40_v21 = vrot.slane %v14_v13, %v31_v11  ;;  %v96_v22 = vrot.slane %v14_v13, %v87_v9  ;;  %v44_v23 = vrot.slane %v14_v13, %v35_v12 }
   0x9   :  { %v104_v24 = vrot.slane %v84_v14, %v83_v8  ;;  %v144_v25 = vrot.slane %v13_v10, %v143_v15  ;;  %v148_v26 = vrot.slane %v13_v10, %v147_v16  ;;  %v152_v27 = vrot.slane %v14_v13, %v143_v15 }
   0xa   :  { %379 = vset.pattern.permute.xlu1 %v386_v4  ;;  %378 = vset.pattern.permute.xlu0 %v386_v4  ;;  %v108_v29 = vrot.slane %v88_v17, %v83_v8  ;;  %v112_v30 = vrot.slane %v92_v18, %v83_v8  ;;  %v52_v32 = vrot.slane %v32_v19, %v31_v11 }
   0xb   :  { %138 = vperm.xlu1 %379, %v16_v3   ;;  %134 = vperm.xlu0 %378, %v15_v2   ;;  %v56_v33 = vrot.slane %v36_v20, %v31_v11  ;;  %v60_v34 = vrot.slane %v40_v21, %v31_v11  ;;  %v116_v35 = vrot.slane %v96_v22, %v83_v8 }
   0xc   :  { %v64_v36 = vrot.slane %v44_v23, %v31_v11  ;;  %v156_v37 = vrot.slane %v14_v13, %v147_v16  ;;  %v164_v39 = vrot.slane %v144_v25, %v143_v15  ;;  %v168_v40 = vrot.slane %v148_v26, %v143_v15 }
   0xd   :  { %v172_v41 = vrot.slane %v152_v27, %v143_v15 }
   0xe   :  { %v176_v55 = vrot.slane %v156_v37, %v143_v15 }
   0xf   :  { %380 = vset.pattern.permute.xlu1 %v387_v5  ;;  %381 = vset.pattern.permute.xlu0 %v387_v5 }
  0x10   :  { %194 = vperm.xlu1 %380, %v15_v2   ;;  %198 = vperm.xlu0 %381, %v16_v3  }
  0x14   :  { %382 = vset.pattern.permute.xlu1 %v385_v1  ;;  %383 = vset.pattern.permute.xlu0 %v385_v1 }
  0x81   :  { %v75_v28 = vpop.permute.xlu1 %74  ;;  %v20_v31 = vpop.permute.xlu0 %19 }
  0x82   :  { %v117_v38 = vmul.f32 %v104_v24, %v75_v28  ;;  %v118_v42 = vmul.f32 %v108_v29, %v75_v28  ;;  %v119_v43 = vmul.f32 %v112_v30, %v75_v28  ;;  %v65_v44 = vmul.f32 %v52_v32, %v20_v31 }
  0x83   :  { %v66_v45 = vmul.f32 %v56_v33, %v20_v31  ;;  %v67_v48 = vmul.f32 %v60_v34, %v20_v31  ;;  %v120_v56 = vmul.f32 %v116_v35, %v75_v28  ;;  %v68_v57 = vmul.f32 %v64_v36, %v20_v31 }
  0x84   :  { %v125_v58 = vadd.f32 %v117_v38, %v65_v44  ;;  %v388_v44 = vmov 0.0  }
  0x85   :  { %v79_v46 = vpop.permute.xlu1 %78  ;;  %v25_v47 = vpop.permute.xlu0 %24  ;;  %v126_v59 = vadd.f32 %v118_v42, %v66_v45  ;;  %v127_v62 = vadd.f32 %v119_v43, %v67_v48  ;;  %v128_v15 = vadd.f32 %v120_v56, %v68_v57  ;;  %260 = vst.msk [vmem:[#allocation3 + $0x8] sm:$0xff] %vm256_vm0, %v388_v44  ;;  %259 = vst.msk [vmem:[#allocation3] sm:$0xff] %vm256_vm0, %v388_v44 }
  0x86   :  { %v121_v49 = vmul.f32 %v104_v24, %v79_v46  ;;  %v122_v50 = vmul.f32 %v108_v29, %v79_v46  ;;  %v123_v51 = vmul.f32 %v112_v30, %v79_v46  ;;  %v69_v52 = vmul.f32 %v52_v32, %v25_v47  ;;  %261 = vst.msk [vmem:[#allocation4] sm:$0xff] %vm256_vm0, %v388_v44 }
  0x87   :  { %v70_v53 = vmul.f32 %v56_v33, %v25_v47  ;;  %v71_v54 = vmul.f32 %v60_v34, %v25_v47  ;;  %v124_v60 = vmul.f32 %v116_v35, %v79_v46  ;;  %v72_v61 = vmul.f32 %v64_v36, %v25_v47  ;;  %262 = vst.msk [vmem:[#allocation4 + $0x8] sm:$0xff] %vm256_vm0, %v388_v44 }
  0x88   :  { %v129_v63 = vadd.f32 %v121_v49, %v69_v52 }
  0x89   :  { %v130_v0 = vadd.f32 %v122_v50, %v70_v53  ;;  %v131_v1 = vadd.f32 %v123_v51, %v71_v54  ;;  %v132_v14 = vadd.f32 %v124_v60, %v72_v61 }
  0x8a   :  { %v139_v2 = vpop.permute.xlu1 %138  ;;  %v135_v3 = vpop.permute.xlu0 %134 }
  0x8b   :  { %v181_v4 = vmul.f32 %v164_v39, %v139_v2  ;;  %v182_v5 = vmul.f32 %v168_v40, %v139_v2  ;;  %v183_v6 = vmul.f32 %v172_v41, %v139_v2  ;;  %v184_v7 = vmul.f32 %v176_v55, %v139_v2 }
  0x8c   :  { %v177_v8 = vmul.f32 %v164_v39, %v135_v3  ;;  %v178_v9 = vmul.f32 %v168_v40, %v135_v3  ;;  %v179_v10 = vmul.f32 %v172_v41, %v135_v3  ;;  %v180_v11 = vmul.f32 %v176_v55, %v135_v3 }
  0x8d   :  { %v189_v12 = vadd.f32 %v181_v4, %v129_v63  ;;  %v190_v13 = vadd.f32 %v182_v5, %v130_v0  ;;  %v191_v18 = vadd.f32 %v183_v6, %v131_v1  ;;  %v192_v22 = vadd.f32 %v184_v7, %v132_v14 }
  0x8e   :  { %v185_v16 = vadd.f32 %v177_v8, %v125_v58  ;;  %v186_v17 = vadd.f32 %v178_v9, %v126_v59  ;;  %v187_v19 = vadd.f32 %v179_v10, %v127_v62  ;;  %v188_v23 = vadd.f32 %v180_v11, %v128_v15  ;;  %v300_v11 = vld [vmem:[#allocation3 + $0x8] sm:$0xff] }
  0x8f   :  { %v195_v20 = vpop.permute.xlu1 %194  ;;  %v199_v21 = vpop.permute.xlu0 %198 }
  0x90   :  { %v201_v24 = vadd.f32 %v195_v20, %v185_v16  ;;  %v202_v25 = vadd.f32 %v195_v20, %v186_v17  ;;  %v205_v26 = vadd.f32 %v199_v21, %v189_v12  ;;  %v206_v27 = vadd.f32 %v199_v21, %v190_v13  ;;  %v299_v12 = vld [vmem:[#allocation3] sm:$0xff]  ;;  %v316_v17 = vld [vmem:[#allocation4] sm:$0xff] }
  0x91   :  { %v207_v28 = vadd.f32 %v199_v21, %v191_v18  ;;  %v203_v30 = vadd.f32 %v195_v20, %v187_v19  ;;  %v208_v32 = vadd.f32 %v199_v21, %v192_v22  ;;  %v204_v34 = vadd.f32 %v195_v20, %v188_v23  ;;  %v317_v20 = vld [vmem:[#allocation4 + $0x8] sm:$0xff] }
  0x92   :  { %v249_v29 = vadd.f32 %v206_v27, %v205_v26  ;;  %v244_v31 = vadd.f32 %v202_v25, %v201_v24 }
  0x94   :  { %v250_v33 = vadd.f32 %v249_v29, %v207_v28  ;;  %v245_v35 = vadd.f32 %v244_v31, %v203_v30 }
  0x96   :  { %v251_v36 = vadd.f32 %v250_v33, %v208_v32  ;;  %v246_v37 = vadd.f32 %v245_v35, %v204_v34 }
  0x98   :  { %252 = vadd.xlane.f32.xlu0 %v251_v36  ;;  %247 = vadd.xlane.f32.xlu1 %v246_v37 }
 0x125   :  { %v253_v38 = vpop.xlane.xlu0 %252  ;;  %v248_v39 = vpop.xlane.xlu1 %247 }
 0x126   :  { %v255_v40 = vmul.f32 0.001953125, %v253_v38  ;;  %v254_v41 = vmul.f32 0.001953125, %v248_v39 }
 0x128   :  { %258 = vst.msk [vmem:[#allocation2 + $0x8] sm:$0xff] %vm256_vm0, %v255_v40  ;;  %257 = vst.msk [vmem:[#allocation2] sm:$0xff] %vm256_vm0, %v254_v41 }
 0x12f   :  { %v423_v42 = vld [vmem:[#allocation2 + $0x8] sm:$0xff]  ;;  %v425_v43 = vld [vmem:[#allocation2] sm:$0xff] }
 0x130   :  { %272 = vperm.xlu0 %383, %v423_v42   ;;  %267 = vperm.xlu1 %382, %v425_v43  }
 0x1af   :  { %v273_v45 = vpop.permute.xlu0 %272  ;;  %v268_v46 = vpop.permute.xlu1 %267 }
 0x1b0   :  { %v279_v47 = vsub.f32 %v205_v26, %v273_v45  ;;  %v280_v48 = vsub.f32 %v206_v27, %v273_v45  ;;  %v275_v49 = vsub.f32 %v201_v24, %v268_v46  ;;  %v276_v50 = vsub.f32 %v202_v25, %v268_v46 }
 0x1b1   :  { %v281_v51 = vsub.f32 %v207_v28, %v273_v45  ;;  %v277_v52 = vsub.f32 %v203_v30, %v268_v46  ;;  %v282_v57 = vsub.f32 %v208_v32, %v273_v45  ;;  %v278_v58 = vsub.f32 %v204_v34, %v268_v46 }
 0x1b2   :  { %v306_v53 = vadd.f32 %v280_v48, %v279_v47  ;;  %v301_v54 = vadd.f32 %v276_v50, %v275_v49  ;;  %v318_v55 = vmul.f32 %v275_v49, %v275_v49  ;;  %v319_v56 = vmul.f32 %v276_v50, %v276_v50 }
 0x1b3   :  { %v322_v59 = vmul.f32 %v279_v47, %v279_v47  ;;  %v323_v60 = vmul.f32 %v280_v48, %v280_v48  ;;  %v320_v63 = vmul.f32 %v277_v52, %v277_v52  ;;  %v321_v5 = vmul.f32 %v278_v58, %v278_v58 }
 0x1b4   :  { %v307_v61 = vadd.f32 %v306_v53, %v281_v51  ;;  %v302_v62 = vadd.f32 %v301_v54, %v277_v52  ;;  %v326_v0 = vadd.f32 %v319_v56, %v318_v55  ;;  %v324_v6 = vmul.f32 %v281_v51, %v281_v51 }
 0x1b5   :  { %v331_v4 = vadd.f32 %v323_v60, %v322_v59  ;;  %v325_v9 = vmul.f32 %v282_v57, %v282_v57 }
 0x1b6   :  { %v308_v1 = vadd.f32 %v307_v61, %v282_v57  ;;  %v303_v2 = vadd.f32 %v302_v62, %v278_v58  ;;  %v327_v3 = vadd.f32 %v326_v0, %v320_v63 }
 0x1b7   :  { %v332_v8 = vadd.f32 %v331_v4, %v324_v6 }
 0x1b8   :  { %309 = vadd.xlane.f32.xlu0 %v308_v1  ;;  %304 = vadd.xlane.f32.xlu1 %v303_v2  ;;  %v328_v7 = vadd.f32 %v327_v3, %v321_v5 }
 0x1b9   :  { %v333_v10 = vadd.f32 %v332_v8, %v325_v9 }
 0x1bc   :  { %329 = vadd.xlane.f32.xlu1 %v328_v7 }
 0x1c0   :  { %334 = vadd.xlane.f32.xlu1 %v333_v10 }
 0x245   :  { %v310_v13 = vpop.xlane.xlu0 %309  ;;  %v305_v14 = vpop.xlane.xlu1 %304 }
 0x246   :  { %v312_v15 = vadd.f32 %v310_v13, %v300_v11  ;;  %v311_v16 = vadd.f32 %v305_v14, %v299_v12 }
 0x248   :  { %315 = vst.msk [vmem:[#allocation3 + $0x8] sm:$0xff] %vm256_vm0, %v312_v15  ;;  %314 = vst.msk [vmem:[#allocation3] sm:$0xff] %vm256_vm0, %v311_v16 }
 0x249   :  { %v330_v18 = vpop.xlane.xlu1 %329 }
 0x24a   :  { %v336_v19 = vadd.f32 %v330_v18, %v316_v17 }
 0x24c   :  { %338 = vst.msk [vmem:[#allocation4] sm:$0xff] %vm256_vm0, %v336_v19 }
 0x24d   :  { %v335_v21 = vpop.xlane.xlu1 %334 }
 0x24e   :  { %v337_v22 = vadd.f32 %v335_v21, %v317_v20 }
 0x24f   :  { %v344_v23 = vld [vmem:[#allocation3 + $0x8] sm:$0xff]  ;;  %v343_v24 = vld [vmem:[#allocation3] sm:$0xff] }
 0x250   :  { %v346_v25 = vmul.f32 0.001953125, %v344_v23  ;;  %v345_v26 = vmul.f32 0.001953125, %v343_v24  ;;  %339 = vst.msk [vmem:[#allocation4 + $0x8] sm:$0xff] %vm256_vm0, %v337_v22 }
 0x252   :  { %v350_v27 = vadd.f32 %v423_v42, %v346_v25  ;;  %v349_v28 = vadd.f32 %v425_v43, %v345_v26  ;;  %v357_v30 = vmul.f32 %v345_v26, %v345_v26  ;;  %v358_v34 = vmul.f32 %v346_v25, %v346_v25 }
 0x253   :  { %v353_v29 = vld [vmem:[#allocation4] sm:$0xff] }
 0x254   :  { %352 = vst.msk [vmem:[%s457_s2 + $0x8] sm:$0xff] %vm256_vm0, %v350_v27  ;;  %351 = vst.msk [vmem:[%s457_s2] sm:$0xff] %vm256_vm0, %v349_v28  ;;  %v355_v31 = vmul.f32 0.001953125, %v353_v29 }
 0x256   :  { %v359_v32 = vsub.f32 %v355_v31, %v357_v30 }
 0x257   :  { %v354_v33 = vld [vmem:[#allocation4 + $0x8] sm:$0xff] }
 0x258   :  { %361 = vst.msk [vmem:[%s458_s3] sm:$0xff] %vm256_vm0, %v359_v32  ;;  %v356_v35 = vmul.f32 0.001953125, %v354_v33 }
 0x25a   :  { %v360_v36 = vsub.f32 %v356_v35, %v358_v34 }
 0x25c   :  { %362 = vst.msk [vmem:[%s458_s3 + $0x8] sm:$0xff] %vm256_vm0, %v360_v36 }

</bundles_post_ra>
